<compile_context>
chip_gen: v6e
topology: v6e:2x2x1
jax: 0.10.0
libtpu: 0.0.40
codegen_flags: <defaults>
</compile_context>

<pallas_src>
import functools

import jax
import jax.numpy as jnp
from jax.experimental import pallas as pl
from jax.experimental.pallas import tpu as pltpu


def _round_up(a: int, b: int) -> int:
    return (a + b - 1) // b * b


# ----------------------------------------------------------------------------
# Kernels
# ----------------------------------------------------------------------------
def _linear_kernel_acc_in_out(x_ref, wt_ref, b_ref, o_ref, *, precision=None):
    """f32 output: accumulate directly into the VMEM-resident output block.

    o_ref's block index is constant along the k grid axis, so it stays resident
    in VMEM across the whole reduction -- no separate accumulator scratch needed.
    """
    k = pl.program_id(2)

    @pl.when(k == 0)
    def _():
        o_ref[...] = jnp.zeros_like(o_ref)

    o_ref[...] += jnp.dot(
        x_ref[...], wt_ref[...],
        preferred_element_type=jnp.float32, precision=precision,
    )

    @pl.when(k == pl.num_programs(2) - 1)
    def _():
        # rand_mask term in the reference forward is identically zero, so the
        # epilogue is just the bias add.
        o_ref[...] += b_ref[...]


def _linear_kernel_scratch(x_ref, wt_ref, b_ref, o_ref, acc_ref, *, precision=None):
    """Narrow (e.g. bf16) output: f32 accumulator scratch + cast in the epilogue."""
    k = pl.program_id(2)

    @pl.when(k == 0)
    def _():
        acc_ref[...] = jnp.zeros_like(acc_ref)

    acc_ref[...] += jnp.dot(
        x_ref[...], wt_ref[...],
        preferred_element_type=jnp.float32, precision=precision,
    )

    @pl.when(k == pl.num_programs(2) - 1)
    def _():
        o_ref[...] = (acc_ref[...] + b_ref[...]).astype(o_ref.dtype)


# ----------------------------------------------------------------------------
# One-time parameter preparation (do this once and cache the result; do NOT
# re-run it per forward call -- that was the main HBM-traffic leak before).
# ----------------------------------------------------------------------------
def prepare_linear_params(weight, bias, *, tn=512, tk=1024, compute_dtype=None):
    """Pre-transpose weight (N,K)->(K,N) and zero-pad to tile-multiple shapes.

    Returns a dict holding the padded operands plus the tiling metadata needed
    by `linear_forward_prepared`. Optionally casts the weight to `compute_dtype`
    (e.g. jnp.bfloat16) for ~2x MXU/DMA throughput with f32 accumulation.
    """
    N, K = weight.shape
    if bias is None:
        bias = jnp.zeros((N,), jnp.float32)
    assert bias.shape == (N,)

    if compute_dtype is not None:
        weight = weight.astype(compute_dtype)

    Np = _round_up(N, 128)   # lane-dense output / weight
    Kp = _round_up(K, 128)   # lane-dense input / sublane-dense weight

    tn = min(tn, Np)
    tk = min(tk, Kp)

    # Megacore heuristic (v7x has 2 TensorCores): if N would fit in a single
    # >=512-wide tile, split it so small-batch shapes still have >=2 parallel
    # N tiles. 256 remains a multiple of the 256-wide MXU on v6e/v7x.
    if Np // tn < 2 and Np > 256:
        tn = 256

    Np = _round_up(Np, tn)
    Kp = _round_up(Kp, tk)

    wt = weight.T                                   # (K, N): N on lanes, feeds MXU directly
    if Kp != K or Np != N:
        wt = jnp.pad(wt, ((0, Kp - K), (0, Np - N)))
    bias2d = bias.astype(jnp.float32).reshape(1, N)
    if Np != N:
        bias2d = jnp.pad(bias2d, ((0, 0), (0, Np - N)))

    return {
        "wt": wt,            # (Kp, Np), pre-transposed + pre-padded
        "bias": bias2d,      # (1, Np), f32
        "N": N, "K": K, "Np": Np, "Kp": Kp, "tn": tn, "tk": tk,
    }


# ----------------------------------------------------------------------------
# Forward
# ----------------------------------------------------------------------------
def linear_forward_prepared(x, params, *, tm=512, precision=None):
    """Pallas equivalent of MyFunction.forward(x, weight, bias) on prepared params."""
    B, K = x.shape
    assert K == params["K"], "weight in_features must match input"

    N, Np, Kp = params["N"], params["Np"], params["Kp"]
    tn, tk = params["tn"], params["tk"]
    wt, bias2d = params["wt"], params["bias"]

    out_dtype = x.dtype
    compute_dtype = wt.dtype
    if x.dtype != compute_dtype:
        x = x.astype(compute_dtype)

    Mp = _round_up(B, 8)        # f32/bf16 sublane alignment
    tm = min(tm, Mp)
    Mp = _round_up(Mp, tm)

    # Zero padding of x only when actually misaligned (padded K rows contribute
    # zero to the accumulation; padded M rows are sliced off below).
    xp = x if (Mp == B and Kp == K) else jnp.pad(x, ((0, Mp - B), (0, Kp - K)))

    grid = (Mp // tm, Np // tn, Kp // tk)

    in_itemsize = jnp.dtype(compute_dtype).itemsize
    out_itemsize = jnp.dtype(out_dtype).itemsize

    # f32 outputs: accumulate straight into the output block, no scratch.
    fast_path = jnp.dtype(out_dtype) == jnp.dtype(jnp.float32)
    if fast_path:
        kernel = functools.partial(_linear_kernel_acc_in_out, precision=precision)
        scratch_shapes = []
    else:
        kernel = functools.partial(_linear_kernel_scratch, precision=precision)
        scratch_shapes = [pltpu.VMEM((tm, tn), jnp.float32)]

    # VMEM budget: double-buffered x / weight / bias tiles + output (+ scratch).
    vmem_need = (
        2 * (tm * tk + tk * tn) * in_itemsize
        + 2 * tn * 4
        + 2 * tm * tn * out_itemsize
        + (0 if fast_path else tm * tn * 4)
    )
    # Cap at 48 MiB so the same config stays safe on v7x (64 MiB physical VMEM
    # per TensorCore) while still unlocking larger-than-default tiles on v5e/v6e.
    vmem_limit = int(min(max(vmem_need * 3 // 2, 32 << 20), 48 << 20))

    # Bytes-accessed estimate including the grid re-read factor:
    #   x is re-read once per N tile, weight once per M tile.
    cost = pl.CostEstimate(
        flops=2 * B * N * K,
        transcendentals=0,
        bytes_accessed=(
            Mp * Kp * (Np // tn) * in_itemsize      # x re-read per j tile
            + Kp * Np * (Mp // tm) * in_itemsize    # weight re-read per i tile
            + Mp * Np * out_itemsize                # output write
            + Np * 4                                # bias
        ),
    )

    out_padded = pl.pallas_call(
        kernel,
        out_shape=jax.ShapeDtypeStruct((Mp, Np), out_dtype),
        grid_spec=pltpu.PrefetchScalarGridSpec(
            num_scalar_prefetch=0,
            grid=grid,
            in_specs=[
                pl.BlockSpec((tm, tk), lambda i, j, k: (i, k)),   # x tile
                pl.BlockSpec((tk, tn), lambda i, j, k: (k, j)),   # weight.T tile
                pl.BlockSpec((1, tn), lambda i, j, k: (0, j)),    # bias row
            ],
            out_specs=pl.BlockSpec((tm, tn), lambda i, j, k: (i, j)),
            scratch_shapes=scratch_shapes,
        ),
        compiler_params=pltpu.CompilerParams(
            dimension_semantics=("parallel", "parallel", "arbitrary"),
            vmem_limit_bytes=vmem_limit,
        ),
        cost_estimate=cost,
    )(xp, wt, bias2d)

    return out_padded[:B, :N]


def linear_forward(x, weight, bias, *, tm=512, tn=512, tk=1024,
                   compute_dtype=None, precision=None):
    """Convenience one-shot wrapper. For repeated calls with the same weights,
    call prepare_linear_params() once, cache it, and use linear_forward_prepared()."""
    params = prepare_linear_params(weight, bias, tn=tn, tk=tk,
                                   compute_dtype=compute_dtype)
    return linear_forward_prepared(x, params, tm=tm, precision=precision)


if __name__ == "__main__":
    # Small shapes consistent with the module: Linear(in_features=32, out=16), batch=8.
    batch, in_features, out_features = 8, 32, 16

    key = jax.random.PRNGKey(0)
    kx, kw, kb = jax.random.split(key, 3)

    x = jax.random.normal(kx, (batch, in_features), dtype=jnp.float32)
    # Deterministic parameter init mimicking uniform_(-0.1, 0.1).
    weight = jax.random.uniform(
        kw, (out_features, in_features), dtype=jnp.float32, minval=-0.1, maxval=0.1
    )
    bias = jax.random.uniform(
        kb, (out_features,), dtype=jnp.float32, minval=-0.1, maxval=0.1
    )

    # Parameter prep runs ONCE (cache this in real use); the forward is the hot path.
    params = prepare_linear_params(weight, bias)
    out = linear_forward_prepared(x, params)
    out = jax.block_until_ready(out)

    # Reference check in plain JAX (the rand_mask term is zero by construction).
    ref = x @ weight.T + bias[None, :]
    assert out.shape == (batch, out_features)
    # Documented tolerance: TPU MXU f32 matmul (default precision) vs. exact f32.
    assert jnp.allclose(out, ref, atol=1e-4, rtol=1e-4), float(jnp.max(jnp.abs(out - ref)))

    print("KERNEL_OK")
</pallas_src>

<mosaic_0001>
module attributes {stable_mosaic.version = 11 : i64} {
  func.func @_linear_kernel_acc_in_out(%arg0: i32, %arg1: i32, %arg2: i32, %arg3: memref<8x128xf32, #tpu.memory_space<vmem>>, %arg4: memref<128x128xf32, #tpu.memory_space<vmem>>, %arg5: memref<1x128xf32, #tpu.memory_space<vmem>>, %arg6: memref<8x128xf32, #tpu.memory_space<vmem>>) attributes {dimension_semantics = [#tpu.dimension_semantics<parallel>, #tpu.dimension_semantics<parallel>, #tpu.dimension_semantics<arbitrary>], iteration_bounds = array<i64: 1, 1, 1>, scalar_prefetch = 0 : i64, scratch_operands = 0 : i64, tpu.core_type = #tpu.core_type<tc>, window_params = [{transform_indices = @transform_0, window_bounds = array<i64: 8, 128>}, {transform_indices = @transform_1, window_bounds = array<i64: 128, 128>}, {transform_indices = @transform_2, window_bounds = array<i64: 1, 128>}, {transform_indices = @transform_3, window_bounds = array<i64: 8, 128>}]} {
    %c0_i32 = arith.constant 0 : i32
    %0 = arith.cmpi eq, %arg2, %c0_i32 : i32
    %1 = arith.extui %0 : i1 to i32
    %c0_i32_0 = arith.constant 0 : i32
    %2 = arith.cmpi ne, %1, %c0_i32_0 : i32
    scf.if %2 {
      %cst_10 = arith.constant 0.000000e+00 : f32
      %12 = vector.broadcast %cst_10 : f32 to vector<8x128xf32>
      %c0_11 = arith.constant 0 : index
      %c0_12 = arith.constant 0 : index
      %13 = vector.load %arg6[%c0_11, %c0_12] : memref<8x128xf32, #tpu.memory_space<vmem>>, vector<8x128xf32>
      tpu.vector_store %arg6[%c0_11, %c0_12], %12 {strides = array<i32>} : memref<8x128xf32, #tpu.memory_space<vmem>>, vector<8x128xf32>,
    } else {
    }
    %c0 = arith.constant 0 : index
    %c0_1 = arith.constant 0 : index
    %3 = vector.load %arg6[%c0, %c0_1] : memref<8x128xf32, #tpu.memory_space<vmem>>, vector<8x128xf32>
    %c0_2 = arith.constant 0 : index
    %c0_3 = arith.constant 0 : index
    %4 = vector.load %arg3[%c0_2, %c0_3] : memref<8x128xf32, #tpu.memory_space<vmem>>, vector<8x128xf32>
    %c0_4 = arith.constant 0 : index
    %c0_5 = arith.constant 0 : index
    %5 = vector.load %arg4[%c0_4, %c0_5] : memref<128x128xf32, #tpu.memory_space<vmem>>, vector<128x128xf32>
    %cst = arith.constant dense<0.000000e+00> : vector<8x128xf32>
    %6 = tpu.matmul %4, %5, %cst {dimension_numbers = #tpu.dot_dimension_numbers<[1], [0], [0], [1], [0, 0, 1, 1], [], []>} : vector<8x128xf32>, vector<128x128xf32>, vector<8x128xf32> -> vector<8x128xf32>
    %7 = arith.addf %3, %6 : vector<8x128xf32>
    %c0_6 = arith.constant 0 : index
    %c0_7 = arith.constant 0 : index
    %8 = vector.load %arg6[%c0_6, %c0_7] : memref<8x128xf32, #tpu.memory_space<vmem>>, vector<8x128xf32>
    tpu.vector_store %arg6[%c0_6, %c0_7], %7 {strides = array<i32>} : memref<8x128xf32, #tpu.memory_space<vmem>>, vector<8x128xf32>,
    %c0_i32_8 = arith.constant 0 : i32
    %9 = arith.cmpi eq, %arg2, %c0_i32_8 : i32
    %10 = arith.extui %9 : i1 to i32
    %c0_i32_9 = arith.constant 0 : i32
    %11 = arith.cmpi ne, %10, %c0_i32_9 : i32
    scf.if %11 {
      %c0_10 = arith.constant 0 : index
      %c0_11 = arith.constant 0 : index
      %12 = vector.load %arg6[%c0_10, %c0_11] : memref<8x128xf32, #tpu.memory_space<vmem>>, vector<8x128xf32>
      %c0_12 = arith.constant 0 : index
      %c0_13 = arith.constant 0 : index
      %13 = vector.load %arg5[%c0_12, %c0_13] : memref<1x128xf32, #tpu.memory_space<vmem>>, vector<1x128xf32>
      %14 = vector.broadcast %13 : vector<1x128xf32> to vector<8x128xf32>
      %15 = arith.addf %12, %14 : vector<8x128xf32>
      %c0_14 = arith.constant 0 : index
      %c0_15 = arith.constant 0 : index
      %16 = vector.load %arg6[%c0_14, %c0_15] : memref<8x128xf32, #tpu.memory_space<vmem>>, vector<8x128xf32>
      tpu.vector_store %arg6[%c0_14, %c0_15], %15 {strides = array<i32>} : memref<8x128xf32, #tpu.memory_space<vmem>>, vector<8x128xf32>,
    } else {
    }
    return
  }
  func.func @transform_0(%arg0: i32, %arg1: i32, %arg2: i32) -> (i32, i32) {
    %c0_i32 = arith.constant 0 : i32
    return %arg0, %arg2 : i32, i32
  }
  func.func @transform_1(%arg0: i32, %arg1: i32, %arg2: i32) -> (i32, i32) {
    %c0_i32 = arith.constant 0 : i32
    return %arg2, %arg1 : i32, i32
  }
  func.func @transform_2(%arg0: i32, %arg1: i32, %arg2: i32) -> (i32, i32) {
    %c0_i32 = arith.constant 0 : i32
    %c0_i32_0 = arith.constant 0 : i32
    return %c0_i32, %arg1 : i32, i32
  }
  func.func @transform_3(%arg0: i32, %arg1: i32, %arg2: i32) -> (i32, i32) {
    %c0_i32 = arith.constant 0 : i32
    return %arg0, %arg1 : i32, i32
  }
}

</mosaic_0001>

<bundles_post_ra>
// kernel: tpu_custom_call.1
= control target key start
LH: loop header
LB: loop body
LE: loop exit
PB: predicated region body
PF: predicated region fallthrough
CT: control target
= control target key end

     0   :  { %8 = vsyncpa [#allocation3], 0  ;;  %s330_s0 = inlined_call_operand.hbm [shape: f32[8,128], index: 0, kind: input, shape index: {}]   ;;  %s331_s1 = inlined_call_operand.hbm [shape: f32[128,128], index: 1, kind: input, shape index: {}]   ;;  %s332_s2 = inlined_call_operand.vmem [shape: f32[1,128], index: 2, kind: input, shape index: {}]   ;;  %s333_s3 = inlined_call_operand.hbm [shape: f32[8,128], index: 3, kind: output, shape index: {}]  }
   0x1   :  { %9 = vsyncpa [#allocation6], 0 }
   0x2   :  { %10 = vsyncpa [#allocation4], 0  ;;  %s291_s12 = smov [#allocation2]   ;;  %s292_s14 = smov [#allocation5]  }
   0x3   :  { %s17_s13 = sshll.u32 %s291_s12, 4  ;;  %s26_s15 = sshll.u32 %s292_s14, 4  ;;  %s18_s13 = int_to_ptr.vmem [resolvable:$true] %s17_s13  ;;  %s27_s15 = int_to_ptr.vmem [resolvable:$true] %s26_s15 }
   0x4   :  { %s233_s16 = scalar_lea.vmem %s18_s13, 128  ;;  %p238_p1 = scmp.lt.s32.totalorder %s18_s13, %s18_s13 }
   0x5   :  { %p234_p0 = scmp.ne.s32.totalorder %s18_s13, %s233_s16  ;;  %p239_p2 = scmp.lt.s32.totalorder %s233_s16, %s233_s16 }
   0x7   :  { %p240_p3 = por %p239_p2, %p238_p1 }
   0x9   :  { %p241_p4 = pnand %p240_p3, %p234_p0 }
   0xb   :  { %244 = shalt.err (!%p241_p4)
}
   0xc   :  { %20 = dma.hbm_to_vmem [thread:$0]  %s330_s0, 128, %s18_s13, [#allocation3]  }
   0xd   :  { %s253_s19 = scalar_lea.vmem %s27_s15, 2048  ;;  %p258_p6 = scmp.lt.s32.totalorder %s27_s15, %s27_s15 }
   0xe   :  { %p254_p5 = scmp.ne.s32.totalorder %s27_s15, %s253_s19  ;;  %p259_p7 = scmp.lt.s32.totalorder %s253_s19, %s253_s19 }
  0x10   :  { %p260_p8 = por %p259_p7, %p258_p6 }
  0x12   :  { %p261_p9 = pnand %p260_p8, %p254_p5 }
  0x14   :  { %264 = shalt.err (!%p261_p9)
}
  0x15   :  { %s293_s20 = smov 128   ;;  %s294_s21 = smov 8  }
  0x16   :  { %32 = dma.hbm_to_vmem [thread:$0]  %s331_s1, 2048, %s27_s15, [#allocation6], %s293_s20, %s293_s20, %s294_s21  }
  0x17   :  { %285 = dma.done.wait [#allocation3], 128  }
  0x18   :  { %286 = vsyncadd [#allocation3], 4294967168 }
  0x19   :  { %287 = dma.done.wait [#allocation6], 2048  }
  0x1a   :  { %288 = vsyncadd [#allocation6], 4294965248  ;;  %v295_v0 = vmov 0.0   ;;  %vm296_vm0 = vmmov 0   ;;  %v63_v1 = vld [vmem:[#allocation5 + $0x78] sm:$0xff]  ;;  %v62_v2 = vld [vmem:[#allocation5 + $0x70] sm:$0xff] }
  0x1b   :  { %183 = vmatprep.subr.mxu0 %v295_v0  ;;  %215 = vmatprep.mubr.msk.f32.mxu0 %vm296_vm0, %v295_v0  ;;  %v61_v3 = vld [vmem:[#allocation5 + $0x68] sm:$0xff]  ;;  %v60_v4 = vld [vmem:[#allocation5 + $0x60] sm:$0xff]  ;;  %v59_v5 = vld [vmem:[#allocation5 + $0x58] sm:$0xff]  ;;  %s297_s24 = smov [#allocation7]  }
  0x1c   :  { %184 = vmatpush3.msra.mxu0 %v63_v1  ;;  %v58_v6 = vld [vmem:[#allocation5 + $0x50] sm:$0xff]  ;;  %v57_v7 = vld [vmem:[#allocation5 + $0x48] sm:$0xff]  ;;  %v56_v8 = vld [vmem:[#allocation5 + $0x40] sm:$0xff]  ;;  %s155_s25 = sshll.u32 %s297_s24, 4  ;;  %s156_s25 = int_to_ptr.vmem [resolvable:$true] %s155_s25 }
  0x1d   :  { %185 = vmatprep.subr.mxu0 %v295_v0  ;;  %v55_v9 = vld [vmem:[#allocation5 + $0x38] sm:$0xff]  ;;  %v54_v10 = vld [vmem:[#allocation5 + $0x30] sm:$0xff]  ;;  %v53_v11 = vld [vmem:[#allocation5 + $0x28] sm:$0xff]  ;;  %s265_s26 = scalar_lea.vmem %s156_s25, 128  ;;  %p270_p11 = scmp.lt.s32.totalorder %s156_s25, %s156_s25 }
  0x1e   :  { %186 = vmatpush3.msra.mxu0 %v62_v2  ;;  %v52_v12 = vld [vmem:[#allocation5 + $0x20] sm:$0xff]  ;;  %v51_v13 = vld [vmem:[#allocation5 + $0x18] sm:$0xff]  ;;  %v50_v14 = vld [vmem:[#allocation5 + $0x10] sm:$0xff]  ;;  %p266_p10 = scmp.ne.s32.totalorder %s156_s25, %s265_s26  ;;  %p271_p12 = scmp.lt.s32.totalorder %s265_s26, %s265_s26 }
  0x1f   :  { %187 = vmatprep.subr.mxu0 %v295_v0  ;;  %v49_v15 = vld [vmem:[#allocation5 + $0x8] sm:$0xff]  ;;  %v48_v16 = vld [vmem:[#allocation5] sm:$0xff]  ;;  %v47_v17 = vld [vmem:[#allocation2] sm:$0xff] }
  0x20   :  { %188 = vmatpush3.msra.mxu0 %v61_v3  ;;  %v165_v19 = vld [vmem:[%s332_s2] ss:$0 sm:$0xff]  ;;  %p272_p13 = por %p271_p12, %p270_p11 }
  0x21   :  { %189 = vmatprep.subr.mxu0 %v295_v0 }
  0x22   :  { %190 = vmatpush3.msra.mxu0 %v60_v4  ;;  %p273_p0 = pnand %p272_p13, %p266_p10 }
  0x23   :  { %191 = vmatprep.subr.mxu0 %v295_v0 }
  0x24   :  { %192 = vmatpush3.msra.mxu0 %v59_v5 }
  0x25   :  { %193 = vmatprep.subr.mxu0 %v295_v0 }
  0x26   :  { %194 = vmatpush3.msra.mxu0 %v58_v6 }
  0x27   :  { %195 = vmatprep.subr.mxu0 %v295_v0 }
  0x28   :  { %196 = vmatpush3.msra.mxu0 %v57_v7 }
  0x29   :  { %197 = vmatprep.subr.mxu0 %v295_v0 }
  0x2a   :  { %198 = vmatpush3.msra.mxu0 %v56_v8 }
  0x2b   :  { %199 = vmatprep.subr.mxu0 %v295_v0 }
  0x2c   :  { %200 = vmatpush3.msra.mxu0 %v55_v9 }
  0x2d   :  { %201 = vmatprep.subr.mxu0 %v295_v0 }
  0x2e   :  { %202 = vmatpush3.msra.mxu0 %v54_v10 }
  0x2f   :  { %203 = vmatprep.subr.mxu0 %v295_v0 }
  0x30   :  { %204 = vmatpush3.msra.mxu0 %v53_v11 }
  0x31   :  { %205 = vmatprep.subr.mxu0 %v295_v0 }
  0x32   :  { %206 = vmatpush3.msra.mxu0 %v52_v12 }
  0x33   :  { %207 = vmatprep.subr.mxu0 %v295_v0 }
  0x34   :  { %208 = vmatpush3.msra.mxu0 %v51_v13 }
  0x35   :  { %209 = vmatprep.subr.mxu0 %v295_v0 }
  0x36   :  { %210 = vmatpush3.msra.mxu0 %v50_v14 }
  0x37   :  { %211 = vmatprep.subr.mxu0 %v295_v0 }
  0x38   :  { %212 = vmatpush3.msra.mxu0 %v49_v15 }
  0x39   :  { %213 = vmatprep.subr.mxu0 %v295_v0 }
  0x3a   :  { %214 = vmatpush3.msra.mxu0 %v48_v16 }
  0x3b   :  { %216 = vmatmul.mubr.f32.vlgmr.msra.gmra.mxu0 %v47_v17 }
  0xfb   :  { %v130_v18 = vpop.f32.mrf.mxu0 }
  0xfc   :  { %v147_v21 = vadd.f32 %v165_v19, %v130_v18 }
  0xfd   :  { %v217_v20 = vpop.f32.mrf.mxu0 }
  0xfe   :  { %148 = vst [vmem:[#allocation7] sm:$0xff] %v147_v21 }
  0xff   :  { %276 = shalt.err (!%p273_p0)
}
 0x100   :  { %158 = dma.vmem_to_hbm [thread:$0]  %s156_s25, 128, %s333_s3, [#allocation4]  }
 0x101   :  { %289 = dma.done.wait [#allocation4], 128  }
 0x102   :  { %290 = vsyncadd [#allocation4], 4294967168 }
 0x103   :  { %162 = vsyncpa [#allocation3], 1 }
 0x104   :  { %163 = vsyncpa [#allocation6], 1 }
 0x105   :  { %164 = vsyncpa [#allocation4], 1 }

</bundles_post_ra>
